<compile_context>
chip_gen: v6e
topology: v6e:2x2x1
jax: 0.10.0
libtpu: 0.0.40
codegen_flags: <defaults>
</compile_context>

<pallas_src>
import jax
import jax.numpy as jnp
from jax.experimental import pallas as pl
from jax.experimental.pallas import tpu as pltpu


def _mlp_kernel(x_ref, w1_ref, b1_ref, w2_ref, b2_ref,
                w3_ref, b3_ref, w4_ref, b4_ref, o_ref):
    # x_ref: (1, T) batch-on-lanes tile.
    x = x_ref[...]

    # Layer 1 (1 -> 80): K == 1 contraction == outer product -> VPU, not MXU.
    h1 = w1_ref[...] * x + b1_ref[...]                      # (80,1)*(1,T)+(80,1) -> (80,T)

    # Layer 2 (80 -> 80): bf16 MXU matmul (weights pre-cast in wrapper), f32 acc.
    a1 = jnp.maximum(h1, 0.0).astype(jnp.bfloat16)
    h2 = jnp.dot(w2_ref[...], a1,
                 preferred_element_type=jnp.float32) + b2_ref[...]   # (80,T)

    # Layer 3 (80 -> 40): bf16 MXU matmul, f32 acc.
    a2 = jnp.maximum(h2, 0.0).astype(jnp.bfloat16)
    h3 = jnp.dot(w3_ref[...], a2,
                 preferred_element_type=jnp.float32) + b3_ref[...]   # (40,T)

    # Layer 4 (40 -> 1): M=1, K=40 is a terrible MXU fill -> VPU multiply +
    # cross-sublane (XLU) reduction instead; a3 stays in f32.
    a3 = jnp.maximum(h3, 0.0)                                         # (40,T)
    out = jnp.sum(w4_ref[...] * a3, axis=0, keepdims=True) + b4_ref[...]  # (1,T)

    o_ref[...] = out.astype(o_ref.dtype)


def _round_up(x, m):
    return ((x + m - 1) // m) * m


def net_forward(x, params, *, tile_n=4096):
    """Full 4-layer MLP forward in one Pallas kernel.

    x: (N, 1) float32 (or (N,)).  Returns (N, 1) float32.
    """
    (w1, b1), (w2, b2), (w3, b3), (w4, b4) = params

    x_flat = x.reshape(-1)
    n = x_flat.shape[0]

    # Tile selection:
    #   * round the requested tile to a multiple of 128 (lane / BlockSpec rule)
    #   * cap at ceil(N/2) rounded up to 128 so large batches always give the
    #     grid >= 2 steps (v7x megacore split), while tiny batches use 1 step.
    tile_req = max(128, _round_up(int(tile_n), 128))
    half_n = _round_up(-(-n // 2), 128)
    tile = min(tile_req, half_n)
    n_pad = _round_up(n, tile)
    x_t = jnp.pad(x_flat, (0, n_pad - n)).reshape(1, n_pad)

    grid = (n_pad // tile,)

    # Pre-cast the MXU-layer weights to bf16 once (hoisted out of the kernel);
    # layer-1 / layer-4 weights stay f32 on the VPU path.  w4 is passed as a
    # (40, 1) column so the kernel's broadcast-multiply + sublane-reduce works.
    w2_bf = w2.astype(jnp.bfloat16)
    w3_bf = w3.astype(jnp.bfloat16)
    w4_col = w4.reshape(1, 40).T                                    # (40, 1) f32

    operands = (x_t, w1, b1, w2_bf, b2, w3_bf, b3, w4_col, b4)

    def resident(shape):
        # Same block index every grid step -> stays VMEM-resident, no re-DMA.
        return pl.BlockSpec(shape, lambda i: (0,) * len(shape))

    # Advisory cost estimate: ~19.7 kFLOP per batch element, x/out traffic
    # plus the (small) resident weight/bias footprint.
    flops_per_elem = 2 * (1 * 80 + 80 * 80 + 80 * 40 + 40 * 1)
    weight_bytes = sum(int(a.size) * a.dtype.itemsize for a in operands[1:])
    cost = pl.CostEstimate(
        flops=flops_per_elem * n_pad,
        transcendentals=0,
        bytes_accessed=8 * n_pad + weight_bytes,
    )

    out_t = pl.pallas_call(
        _mlp_kernel,
        out_shape=jax.ShapeDtypeStruct((1, n_pad), jnp.float32),
        grid=grid,
        in_specs=[
            pl.BlockSpec((1, tile), lambda i: (0, i)),        # x tile (batch on lanes)
            resident(w1.shape), resident(b1.shape),
            resident(w2_bf.shape), resident(b2.shape),
            resident(w3_bf.shape), resident(b3.shape),
            resident(w4_col.shape), resident(b4.shape),
        ],
        out_specs=pl.BlockSpec((1, tile), lambda i: (0, i)),
        compiler_params=pltpu.CompilerParams(
            dimension_semantics=("parallel",),                # v7x megacore batch split
            vmem_limit_bytes=32 * 1024 * 1024,                # headroom for 4096-lane tiles (v5e default ~16 MiB)
        ),
        cost_estimate=cost,
    )(*operands)

    return out_t[0, :n].reshape(n, 1)


def init_params(key):
    """torch.nn.Linear-style init: U(-1/sqrt(fan_in), +1/sqrt(fan_in)).

    Weights stored (out_features, in_features); biases (out_features, 1)."""
    dims = [(1, 80), (80, 80), (80, 40), (40, 1)]
    params = []
    for fan_in, fan_out in dims:
        key, kw, kb = jax.random.split(key, 3)
        bound = 1.0 / float(fan_in) ** 0.5
        w = jax.random.uniform(kw, (fan_out, fan_in), jnp.float32, -bound, bound)
        b = jax.random.uniform(kb, (fan_out, 1), jnp.float32, -bound, bound)
        params.append((w, b))
    return params


def net_forward_ref(x, params):
    """Pure-f32 reference (matches the PyTorch module exactly)."""
    (w1, b1), (w2, b2), (w3, b3), (w4, b4) = params
    h = x @ w1.T + b1.T
    h = jnp.maximum(h, 0.0) @ w2.T + b2.T
    h = jnp.maximum(h, 0.0) @ w3.T + b3.T
    return jnp.maximum(h, 0.0) @ w4.T + b4.T


def net_forward_ref_bf16(x, params):
    """Reference mirroring the kernel: bf16 inputs on layers 2/3 (f32 acc),
    f32 everywhere else (layer 4 is a pure-f32 VPU reduce in the kernel)."""
    (w1, b1), (w2, b2), (w3, b3), (w4, b4) = params
    h1 = x @ w1.T + b1.T
    a1 = jnp.maximum(h1, 0.0).astype(jnp.bfloat16)
    h2 = jnp.dot(a1, w2.T.astype(jnp.bfloat16),
                 preferred_element_type=jnp.float32) + b2.T
    a2 = jnp.maximum(h2, 0.0).astype(jnp.bfloat16)
    h3 = jnp.dot(a2, w3.T.astype(jnp.bfloat16),
                 preferred_element_type=jnp.float32) + b3.T
    a3 = jnp.maximum(h3, 0.0)
    return a3 @ w4.T + b4.T


if __name__ == "__main__":
    key = jax.random.PRNGKey(0)
    key, kx = jax.random.split(key)
    params = init_params(key)

    batch = 8
    x = jax.random.normal(kx, (batch, 1), jnp.float32)

    out = net_forward(x, params)
    out = jax.block_until_ready(out)
    assert out.shape == (batch, 1)

    # Tight check against a reference mirroring the kernel's bf16 matmuls,
    # loose check against the pure-f32 PyTorch-equivalent reference.
    assert jnp.allclose(out, net_forward_ref_bf16(x, params),
                        atol=2e-3, rtol=2e-3), "mismatch vs bf16-mimic reference"
    assert jnp.allclose(out, net_forward_ref(x, params),
                        atol=5e-2, rtol=5e-2), "mismatch vs f32 reference"

    # Exercise the multi-tile pipelined path + last-tile padding (N % tile != 0)
    # and the >=2-grid-step megacore cap.
    key, kx2 = jax.random.split(key)
    x2 = jax.random.normal(kx2, (600, 1), jnp.float32)
    out2 = jax.block_until_ready(net_forward(x2, params))
    assert out2.shape == (600, 1)
    assert jnp.allclose(out2, net_forward_ref_bf16(x2, params),
                        atol=2e-3, rtol=2e-3), "mismatch on tiled batch"

    # Robustness: caller-supplied tile_n not a multiple of 128 gets rounded.
    out3 = jax.block_until_ready(net_forward(x2, params, tile_n=500))
    assert jnp.allclose(out3, out2, atol=1e-6, rtol=1e-6), "tile rounding changed results"

    print("KERNEL_OK")
</pallas_src>

<mosaic_0001>
module attributes {stable_mosaic.version = 11 : i64} {
  func.func @_mlp_kernel(%arg0: i32, %arg1: memref<1x128xf32, #tpu.memory_space<vmem>>, %arg2: memref<80x1xf32, #tpu.memory_space<vmem>>, %arg3: memref<80x1xf32, #tpu.memory_space<vmem>>, %arg4: memref<80x80xbf16, #tpu.memory_space<vmem>>, %arg5: memref<80x1xf32, #tpu.memory_space<vmem>>, %arg6: memref<40x80xbf16, #tpu.memory_space<vmem>>, %arg7: memref<40x1xf32, #tpu.memory_space<vmem>>, %arg8: memref<40x1xf32, #tpu.memory_space<vmem>>, %arg9: memref<1x1xf32, #tpu.memory_space<vmem>>, %arg10: memref<1x128xf32, #tpu.memory_space<vmem>>) attributes {dimension_semantics = [#tpu.dimension_semantics<parallel>], iteration_bounds = array<i64: 1>, scalar_prefetch = 0 : i64, scratch_operands = 0 : i64, tpu.core_type = #tpu.core_type<tc>, window_params = [{transform_indices = @transform_0, window_bounds = array<i64: 1, 128>}, {pipeline_mode = #tpu.pipeline_mode<synchronous>, transform_indices = @transform_1, window_bounds = array<i64: 80, 1>}, {pipeline_mode = #tpu.pipeline_mode<synchronous>, transform_indices = @transform_2, window_bounds = array<i64: 80, 1>}, {pipeline_mode = #tpu.pipeline_mode<synchronous>, transform_indices = @transform_3, window_bounds = array<i64: 80, 80>}, {pipeline_mode = #tpu.pipeline_mode<synchronous>, transform_indices = @transform_4, window_bounds = array<i64: 80, 1>}, {pipeline_mode = #tpu.pipeline_mode<synchronous>, transform_indices = @transform_5, window_bounds = array<i64: 40, 80>}, {pipeline_mode = #tpu.pipeline_mode<synchronous>, transform_indices = @transform_6, window_bounds = array<i64: 40, 1>}, {pipeline_mode = #tpu.pipeline_mode<synchronous>, transform_indices = @transform_7, window_bounds = array<i64: 40, 1>}, {pipeline_mode = #tpu.pipeline_mode<synchronous>, transform_indices = @transform_8, window_bounds = array<i64: 1, 1>}, {transform_indices = @transform_9, window_bounds = array<i64: 1, 128>}]} {
    %c0 = arith.constant 0 : index
    %c0_0 = arith.constant 0 : index
    %0 = vector.load %arg1[%c0, %c0_0] : memref<1x128xf32, #tpu.memory_space<vmem>>, vector<1x128xf32>
    %c0_1 = arith.constant 0 : index
    %c0_2 = arith.constant 0 : index
    %1 = vector.load %arg2[%c0_1, %c0_2] : memref<80x1xf32, #tpu.memory_space<vmem>>, vector<80x1xf32>
    %2 = vector.broadcast %1 : vector<80x1xf32> to vector<80x128xf32>
    %3 = vector.broadcast %0 : vector<1x128xf32> to vector<80x128xf32>
    %4 = arith.mulf %2, %3 : vector<80x128xf32>
    %c0_3 = arith.constant 0 : index
    %c0_4 = arith.constant 0 : index
    %5 = vector.load %arg3[%c0_3, %c0_4] : memref<80x1xf32, #tpu.memory_space<vmem>>, vector<80x1xf32>
    %6 = vector.broadcast %5 : vector<80x1xf32> to vector<80x128xf32>
    %7 = arith.addf %4, %6 : vector<80x128xf32>
    %cst = arith.constant 0.000000e+00 : f32
    %8 = vector.broadcast %cst : f32 to vector<80x128xf32>
    %9 = arith.maximumf %7, %8 : vector<80x128xf32>
    %10 = arith.truncf %9 : vector<80x128xf32> to vector<80x128xbf16>
    %c0_5 = arith.constant 0 : index
    %c0_6 = arith.constant 0 : index
    %11 = vector.load %arg4[%c0_5, %c0_6] : memref<80x80xbf16, #tpu.memory_space<vmem>>, vector<80x80xbf16>
    %cst_7 = arith.constant dense<0.000000e+00> : vector<80x128xf32>
    %12 = tpu.matmul %11, %10, %cst_7 {dimension_numbers = #tpu.dot_dimension_numbers<[1], [0], [0], [1], [0, 0, 1, 1], [], []>} : vector<80x80xbf16>, vector<80x128xbf16>, vector<80x128xf32> -> vector<80x128xf32>
    %c0_8 = arith.constant 0 : index
    %c0_9 = arith.constant 0 : index
    %13 = vector.load %arg5[%c0_8, %c0_9] : memref<80x1xf32, #tpu.memory_space<vmem>>, vector<80x1xf32>
    %14 = vector.broadcast %13 : vector<80x1xf32> to vector<80x128xf32>
    %15 = arith.addf %12, %14 : vector<80x128xf32>
    %cst_10 = arith.constant 0.000000e+00 : f32
    %16 = vector.broadcast %cst_10 : f32 to vector<80x128xf32>
    %17 = arith.maximumf %15, %16 : vector<80x128xf32>
    %18 = arith.truncf %17 : vector<80x128xf32> to vector<80x128xbf16>
    %c0_11 = arith.constant 0 : index
    %c0_12 = arith.constant 0 : index
    %19 = vector.load %arg6[%c0_11, %c0_12] : memref<40x80xbf16, #tpu.memory_space<vmem>>, vector<40x80xbf16>
    %cst_13 = arith.constant dense<0.000000e+00> : vector<40x128xf32>
    %20 = tpu.matmul %19, %18, %cst_13 {dimension_numbers = #tpu.dot_dimension_numbers<[1], [0], [0], [1], [0, 0, 1, 1], [], []>} : vector<40x80xbf16>, vector<80x128xbf16>, vector<40x128xf32> -> vector<40x128xf32>
    %c0_14 = arith.constant 0 : index
    %c0_15 = arith.constant 0 : index
    %21 = vector.load %arg7[%c0_14, %c0_15] : memref<40x1xf32, #tpu.memory_space<vmem>>, vector<40x1xf32>
    %22 = vector.broadcast %21 : vector<40x1xf32> to vector<40x128xf32>
    %23 = arith.addf %20, %22 : vector<40x128xf32>
    %cst_16 = arith.constant 0.000000e+00 : f32
    %24 = vector.broadcast %cst_16 : f32 to vector<40x128xf32>
    %25 = arith.maximumf %23, %24 : vector<40x128xf32>
    %c0_17 = arith.constant 0 : index
    %c0_18 = arith.constant 0 : index
    %26 = vector.load %arg8[%c0_17, %c0_18] : memref<40x1xf32, #tpu.memory_space<vmem>>, vector<40x1xf32>
    %27 = vector.broadcast %26 : vector<40x1xf32> to vector<40x128xf32>
    %28 = arith.mulf %27, %25 : vector<40x128xf32>
    %cst_19 = arith.constant dense<0.000000e+00> : vector<128xf32>
    %29 = vector.multi_reduction <add>, %28, %cst_19 [0] : vector<40x128xf32> to vector<128xf32>
    %30 = vector.shape_cast %29 : vector<128xf32> to vector<1x128xf32>
    %c0_20 = arith.constant 0 : index
    %c0_21 = arith.constant 0 : index
    %31 = vector.load %arg9[%c0_20, %c0_21] : memref<1x1xf32, #tpu.memory_space<vmem>>, vector<1x1xf32>
    %32 = vector.broadcast %31 : vector<1x1xf32> to vector<1x128xf32>
    %33 = arith.addf %30, %32 : vector<1x128xf32>
    %c0_22 = arith.constant 0 : index
    %c0_23 = arith.constant 0 : index
    %34 = vector.load %arg10[%c0_22, %c0_23] : memref<1x128xf32, #tpu.memory_space<vmem>>, vector<1x128xf32>
    tpu.vector_store %arg10[%c0_22, %c0_23], %33 {strides = array<i32>} : memref<1x128xf32, #tpu.memory_space<vmem>>, vector<1x128xf32>,
    return
  }
  func.func @transform_0(%arg0: i32) -> (i32, i32) {
    %c0_i32 = arith.constant 0 : i32
    %c0_i32_0 = arith.constant 0 : i32
    return %c0_i32, %arg0 : i32, i32
  }
  func.func @transform_1(%arg0: i32) -> (i32, i32) {
    %c0_i32 = arith.constant 0 : i32
    %c0_i32_0 = arith.constant 0 : i32
    %c0_i32_1 = arith.constant 0 : i32
    return %c0_i32, %c0_i32_0 : i32, i32
  }
  func.func @transform_2(%arg0: i32) -> (i32, i32) {
    %c0_i32 = arith.constant 0 : i32
    %c0_i32_0 = arith.constant 0 : i32
    %c0_i32_1 = arith.constant 0 : i32
    return %c0_i32, %c0_i32_0 : i32, i32
  }
  func.func @transform_3(%arg0: i32) -> (i32, i32) {
    %c0_i32 = arith.constant 0 : i32
    %c0_i32_0 = arith.constant 0 : i32
    %c0_i32_1 = arith.constant 0 : i32
    return %c0_i32, %c0_i32_0 : i32, i32
  }
  func.func @transform_4(%arg0: i32) -> (i32, i32) {
    %c0_i32 = arith.constant 0 : i32
    %c0_i32_0 = arith.constant 0 : i32
    %c0_i32_1 = arith.constant 0 : i32
    return %c0_i32, %c0_i32_0 : i32, i32
  }
  func.func @transform_5(%arg0: i32) -> (i32, i32) {
    %c0_i32 = arith.constant 0 : i32
    %c0_i32_0 = arith.constant 0 : i32
    %c0_i32_1 = arith.constant 0 : i32
    return %c0_i32, %c0_i32_0 : i32, i32
  }
  func.func @transform_6(%arg0: i32) -> (i32, i32) {
    %c0_i32 = arith.constant 0 : i32
    %c0_i32_0 = arith.constant 0 : i32
    %c0_i32_1 = arith.constant 0 : i32
    return %c0_i32, %c0_i32_0 : i32, i32
  }
  func.func @transform_7(%arg0: i32) -> (i32, i32) {
    %c0_i32 = arith.constant 0 : i32
    %c0_i32_0 = arith.constant 0 : i32
    %c0_i32_1 = arith.constant 0 : i32
    return %c0_i32, %c0_i32_0 : i32, i32
  }
  func.func @transform_8(%arg0: i32) -> (i32, i32) {
    %c0_i32 = arith.constant 0 : i32
    %c0_i32_0 = arith.constant 0 : i32
    %c0_i32_1 = arith.constant 0 : i32
    return %c0_i32, %c0_i32_0 : i32, i32
  }
  func.func @transform_9(%arg0: i32) -> (i32, i32) {
    %c0_i32 = arith.constant 0 : i32
    %c0_i32_0 = arith.constant 0 : i32
    return %c0_i32, %arg0 : i32, i32
  }
}

</mosaic_0001>

<bundles_post_ra>
// kernel: tpu_custom_call.1
= control target key start
LH: loop header
LB: loop body
LE: loop exit
PB: predicated region body
PF: predicated region fallthrough
CT: control target
= control target key end

     0   :  { %s950_s0 = inlined_call_operand.vmem [shape: f32[1,128], index: 0, kind: input, shape index: {}]   ;;  %s951_s1 = inlined_call_operand.vmem [shape: f32[80,1], index: 1, kind: input, shape index: {}]   ;;  %s952_s2 = inlined_call_operand.vmem [shape: f32[80,1], index: 2, kind: input, shape index: {}]   ;;  %s953_s3 = inlined_call_operand.vmem [shape: bf16[80,80], index: 3, kind: input, shape index: {}]   ;;  %s954_s4 = inlined_call_operand.vmem [shape: f32[80,1], index: 4, kind: input, shape index: {}]   ;;  %s955_s5 = inlined_call_operand.vmem [shape: bf16[40,80], index: 5, kind: input, shape index: {}]   ;;  %s956_s6 = inlined_call_operand.vmem [shape: f32[40,1], index: 6, kind: input, shape index: {}]   ;;  %s957_s7 = inlined_call_operand.vmem [shape: f32[40,1], index: 7, kind: input, shape index: {}]   ;;  %s958_s8 = inlined_call_operand.<no memory space> [shape: f32[1,1], index: 8, kind: input, shape index: {}]   ;;  %s959_s9 = inlined_call_operand.hbm [shape: f32[1,128], index: 9, kind: output, shape index: {}]  }
   0x1   :  { %v14_v0 = vstv %s958_s8 }
   0x2   :  { %15 = vst [vmem:[#allocation2] sm:$0x1] %v14_v0 }
   0x3   :  { %v121_v1 = vld [vmem:[%s952_s2 + $0x40] sm:$0xff]  ;;  %v709_v3 = vmov 0   ;;  %v122_v4 = vld [vmem:[%s952_s2 + $0x48] sm:$0xff]  ;;  %v44_v6 = vld [vmem:[%s951_s1 + $0x38] sm:$0xff]  ;;  %v710_v8 = vmov 0.0  }
   0x4   :  { %v45_v2 = vld [vmem:[%s951_s1 + $0x40] sm:$0xff]  ;;  %678 = vset.pattern.permute.xlu1 %v709_v3  ;;  %677 = vset.pattern.permute.xlu0 %v709_v3  ;;  %v46_v5 = vld [vmem:[%s951_s1 + $0x48] sm:$0xff]  ;;  %v43_v7 = vld [vmem:[%s951_s1 + $0x30] sm:$0xff] }
   0x5   :  { %165 = vperm.xlu1 %678, %v121_v1   ;;  %89 = vperm.xlu0 %677, %v45_v2   ;;  %v120_v9 = vld [vmem:[%s952_s2 + $0x38] sm:$0xff]  ;;  %v119_v10 = vld [vmem:[%s952_s2 + $0x30] sm:$0xff]  ;;  %v42_v11 = vld [vmem:[%s951_s1 + $0x28] sm:$0xff] }
   0x6   :  { %621 = vmatprep.subr.bf16.mxu0 %v710_v8  ;;  %651 = vmatprep.subr.bf16.mxu1 %v710_v8  ;;  %v41_v12 = vld [vmem:[%s951_s1 + $0x20] sm:$0xff]  ;;  %v118_v13 = vld [vmem:[%s952_s2 + $0x28] sm:$0xff] }
   0x7   :  { %v117_v14 = vld [vmem:[%s952_s2 + $0x20] sm:$0xff] }
   0x9   :  { %170 = vperm.xlu1 %678, %v122_v4   ;;  %94 = vperm.xlu0 %677, %v46_v5  }
   0xd   :  { %84 = vperm.xlu1 %678, %v44_v6   ;;  %79 = vperm.xlu0 %677, %v43_v7  }
  0x11   :  { %160 = vperm.xlu1 %678, %v120_v9   ;;  %155 = vperm.xlu0 %677, %v119_v10  }
  0x15   :  { %74 = vperm.xlu1 %678, %v42_v11   ;;  %69 = vperm.xlu0 %677, %v41_v12  }
  0x16   :  { %16 = vsyncpa [#allocation4], 0  ;;  %v40_v15 = vld [vmem:[%s951_s1 + $0x18] sm:$0xff]  ;;  %v39_v16 = vld [vmem:[%s951_s1 + $0x10] sm:$0xff]  ;;  %vm711_vm0 = vmmov 0   ;;  %vm293_vm1 = vcmask 654336  }
  0x17   :  { %v116_v17 = vld [vmem:[%s952_s2 + $0x18] sm:$0xff]  ;;  %v115_v18 = vld [vmem:[%s952_s2 + $0x10] sm:$0xff]  ;;  %v38_v19 = vld [vmem:[%s951_s1 + $0x8] sm:$0xff]  ;;  %631 = vmatprep.mubr.msk.bf16.mxu0 %vm711_vm0, %v710_v8  ;;  %661 = vmatprep.mubr.msk.bf16.mxu1 %vm711_vm0, %v710_v8 }
  0x18   :  { %v37_v20 = vld [vmem:[%s951_s1] sm:$0xff]  ;;  %v114_v21 = vld [vmem:[%s952_s2 + $0x8] sm:$0xff]  ;;  %v215_v25 = vld [vmem:[%s954_s4 + $0x38] sm:$0xff] }
  0x19   :  { %150 = vperm.xlu1 %678, %v118_v13   ;;  %145 = vperm.xlu0 %677, %v117_v14   ;;  %v113_v22 = vld [vmem:[%s952_s2] sm:$0xff]  ;;  %v217_v23 = vld [vmem:[%s954_s4 + $0x48] sm:$0xff]  ;;  %v214_v26 = vld [vmem:[%s954_s4 + $0x30] sm:$0xff] }
  0x1a   :  { %v216_v24 = vld [vmem:[%s954_s4 + $0x40] sm:$0xff]  ;;  %v213_v27 = vld [vmem:[%s954_s4 + $0x28] sm:$0xff]  ;;  %v211_v29 = vld [vmem:[%s954_s4 + $0x18] sm:$0xff] }
  0x1b   :  { %v212_v28 = vld [vmem:[%s954_s4 + $0x20] sm:$0xff]  ;;  %v210_v30 = vld [vmem:[%s954_s4 + $0x10] sm:$0xff]  ;;  %v209_v31 = vld [vmem:[%s954_s4 + $0x8] sm:$0xff] }
  0x1c   :  { %v208_v32 = vld [vmem:[%s954_s4] sm:$0xff]  ;;  %v403_v33 = vld [vmem:[%s956_s6 + $0x8] sm:$0xff]  ;;  %v405_v35 = vld [vmem:[%s956_s6 + $0x18] sm:$0xff] }
  0x1d   :  { %64 = vperm.xlu1 %678, %v40_v15   ;;  %59 = vperm.xlu0 %677, %v39_v16   ;;  %v402_v34 = vld [vmem:[%s956_s6] sm:$0xff]  ;;  %v404_v36 = vld [vmem:[%s956_s6 + $0x10] sm:$0xff]  ;;  %v516_v37 = vld [vmem:[%s957_s7 + $0x8] sm:$0xff] }
  0x1e   :  { %v515_v38 = vld [vmem:[%s957_s7] sm:$0xff]  ;;  %v517_v39 = vld [vmem:[%s957_s7 + $0x10] sm:$0xff]  ;;  %v518_v42 = vld [vmem:[%s957_s7 + $0x18] sm:$0xff] }
  0x1f   :  { %v406_v40 = vld [vmem:[%s956_s6 + $0x20] sm:$0xff] }
  0x20   :  { %v519_v41 = vld [vmem:[%s957_s7 + $0x20] sm:$0xff] }
  0x21   :  { %140 = vperm.xlu1 %678, %v116_v17   ;;  %135 = vperm.xlu0 %677, %v115_v18   ;;  %v560_v43 = vld [vmem:[#allocation2] sm:$0x1] }
  0x22   :  { %v586_v44 = vld [vmem:[%s950_s0] ss:$0 sm:$0xff] }
  0x25   :  { %54 = vperm.xlu1 %678, %v38_v19   ;;  %49 = vperm.xlu0 %677, %v37_v20  }
  0x29   :  { %130 = vperm.xlu1 %678, %v114_v21   ;;  %125 = vperm.xlu0 %677, %v113_v22  }
  0x2d   :  { %265 = vperm.xlu1 %678, %v217_v23   ;;  %260 = vperm.xlu0 %677, %v216_v24  }
  0x31   :  { %255 = vperm.xlu1 %678, %v215_v25   ;;  %250 = vperm.xlu0 %677, %v214_v26  }
  0x35   :  { %245 = vperm.xlu1 %678, %v213_v27   ;;  %240 = vperm.xlu0 %677, %v212_v28  }
  0x39   :  { %235 = vperm.xlu1 %678, %v211_v29   ;;  %230 = vperm.xlu0 %677, %v210_v30  }
  0x3d   :  { %225 = vperm.xlu1 %678, %v209_v31   ;;  %220 = vperm.xlu0 %677, %v208_v32  }
  0x41   :  { %414 = vperm.xlu1 %678, %v403_v33   ;;  %409 = vperm.xlu0 %677, %v402_v34  }
  0x45   :  { %424 = vperm.xlu1 %678, %v405_v35   ;;  %419 = vperm.xlu0 %677, %v404_v36  }
  0x49   :  { %527 = vperm.xlu1 %678, %v516_v37   ;;  %522 = vperm.xlu0 %677, %v515_v38   ;;  %v679_v37 = vld [vmem:[%s953_s3] sm:$0xff]   ;;  %v680_v38 = vld [vmem:[%s953_s3 + $0x8] sm:$0xff]  }
  0x4d   :  { %532 = vperm.xlu1 %678, %v517_v39   ;;  %429 = vperm.xlu0 %677, %v406_v40   ;;  %v681_v39 = vld [vmem:[%s953_s3 + $0x10] sm:$0xff]   ;;  %v682_v40 = vld [vmem:[%s953_s3 + $0x18] sm:$0xff]  }
  0x51   :  { %542 = vperm.xlu1 %678, %v519_v41   ;;  %537 = vperm.xlu0 %677, %v518_v42   ;;  %v683_v41 = vld [vmem:[%s953_s3 + $0x20] sm:$0xff]  }
  0x55   :  { %563 = vperm.xlu0 %677, %v560_v43  }
  0x80   :  { %v166_v45 = vpop.permute.xlu1 %165  ;;  %v90_v46 = vpop.permute.xlu0 %89 }
  0x81   :  { %v111_v47 = vmul.f32 %v586_v44, %v90_v46 }
  0x83   :  { %v181_v50 = vadd.f32 %v166_v45, %v111_v47 }
  0x84   :  { %v171_v48 = vpop.permute.xlu1 %170  ;;  %v95_v49 = vpop.permute.xlu0 %94 }
  0x85   :  { %v112_v51 = vmul.f32 %v586_v44, %v95_v49  ;;  %v191_v55 = vmax.f32 %v181_v50, 0.0 }
  0x87   :  { %v182_v52 = vadd.f32 %v171_v48, %v112_v51 }
  0x88   :  { %v85_v53 = vpop.permute.xlu1 %84  ;;  %v80_v54 = vpop.permute.xlu0 %79 }
  0x89   :  { %v192_v56 = vmax.f32 %v182_v52, 0.0  ;;  %v110_v57 = vmul.f32 %v586_v44, %v85_v53  ;;  %v109_v58 = vmul.f32 %v586_v44, %v80_v54 }
  0x8b   :  { %v197_v59 = vpack.c.bf16 %v192_v56, %v191_v55 }
  0x8c   :  { %v161_v60 = vpop.permute.xlu1 %160  ;;  %v156_v61 = vpop.permute.xlu0 %155 }
  0x8d   :  { %v180_v62 = vadd.f32 %v161_v60, %v110_v57  ;;  %v179_v63 = vadd.f32 %v156_v61, %v109_v58  ;;  %622 = vmatpush3.bf16.msra.mxu0 %v197_v59 }
  0x8e   :  { %623 = vmatprep.subr.bf16.mxu0 %v710_v8 }
  0x8f   :  { %v190_v0 = vmax.f32 %v180_v62, 0.0  ;;  %v189_v1 = vmax.f32 %v179_v63, 0.0 }
  0x90   :  { %v75_v2 = vpop.permute.xlu1 %74  ;;  %v70_v3 = vpop.permute.xlu0 %69 }
  0x91   :  { %v196_v4 = vpack.c.bf16 %v190_v0, %v189_v1  ;;  %v108_v5 = vmul.f32 %v586_v44, %v75_v2  ;;  %v107_v6 = vmul.f32 %v586_v44, %v70_v3 }
  0x93   :  { %624 = vmatpush3.bf16.msra.mxu0 %v196_v4 }
  0x94   :  { %v151_v7 = vpop.permute.xlu1 %150  ;;  %v146_v9 = vpop.permute.xlu0 %145  ;;  %625 = vmatprep.subr.bf16.mxu0 %v710_v8 }
  0x95   :  { %v178_v10 = vadd.f32 %v151_v7, %v108_v5  ;;  %v177_v11 = vadd.f32 %v146_v9, %v107_v6 }
  0x97   :  { %v188_v12 = vmax.f32 %v178_v10, 0.0  ;;  %v187_v13 = vmax.f32 %v177_v11, 0.0 }
  0x98   :  { %v65_v14 = vpop.permute.xlu1 %64  ;;  %v60_v15 = vpop.permute.xlu0 %59 }
  0x99   :  { %v195_v16 = vpack.c.bf16 %v188_v12, %v187_v13  ;;  %v106_v17 = vmul.f32 %v586_v44, %v65_v14  ;;  %v105_v18 = vmul.f32 %v586_v44, %v60_v15 }
  0x9b   :  { %626 = vmatpush3.bf16.msra.mxu0 %v195_v16 }
  0x9c   :  { %v141_v19 = vpop.permute.xlu1 %140  ;;  %v136_v20 = vpop.permute.xlu0 %135  ;;  %627 = vmatprep.subr.bf16.mxu0 %v710_v8 }
  0x9d   :  { %v176_v21 = vadd.f32 %v141_v19, %v106_v17  ;;  %v175_v22 = vadd.f32 %v136_v20, %v105_v18 }
  0x9f   :  { %v186_v23 = vmax.f32 %v176_v21, 0.0  ;;  %v185_v24 = vmax.f32 %v175_v22, 0.0 }
  0xa0   :  { %v55_v25 = vpop.permute.xlu1 %54  ;;  %v50_v26 = vpop.permute.xlu0 %49 }
  0xa1   :  { %v194_v27 = vpack.c.bf16 %v186_v23, %v185_v24  ;;  %v104_v28 = vmul.f32 %v586_v44, %v55_v25  ;;  %v103_v29 = vmul.f32 %v586_v44, %v50_v26 }
  0xa3   :  { %628 = vmatpush3.bf16.msra.mxu0 %v194_v27 }
  0xa4   :  { %v131_v30 = vpop.permute.xlu1 %130  ;;  %v126_v31 = vpop.permute.xlu0 %125  ;;  %629 = vmatprep.subr.bf16.mxu0 %v710_v8 }
  0xa5   :  { %v174_v32 = vadd.f32 %v131_v30, %v104_v28  ;;  %v173_v33 = vadd.f32 %v126_v31, %v103_v29 }
  0xa7   :  { %v184_v34 = vmax.f32 %v174_v32, 0.0  ;;  %v183_v35 = vmax.f32 %v173_v33, 0.0 }
  0xa8   :  { %v266_v54 = vpop.permute.xlu1 %265  ;;  %v261_v56 = vpop.permute.xlu0 %260 }
  0xa9   :  { %v193_v36 = vpack.c.bf16 %v184_v34, %v183_v35  ;;  %v684_v34 = vld [vmem:[%s955_s5] sm:$0xff]   ;;  %v685_v35 = vld [vmem:[%s955_s5 + $0x8] sm:$0xff]  }
  0xab   :  { %630 = vmatpush3.bf16.msra.mxu0 %v193_v36  ;;  %v686_v36 = vld [vmem:[%s955_s5 + $0x10] ss:$0 sps:$4 sm:$0xff]   ;;  %s712_s5 = smov [#allocation3]  }
  0xac   :  { %v256_v59 = vpop.permute.xlu1 %255  ;;  %v251_v61 = vpop.permute.xlu0 %250  ;;  %s578_s1 = sshll.u32 %s712_s5, 4  ;;  %s579_s1 = int_to_ptr.vmem [resolvable:$true] %s578_s1 }
  0xad   :  { %s687_s11 = scalar_lea.vmem %s579_s1, 16  ;;  %s691_s12 = scalar_lea.vmem %s579_s1, 32 }
  0xae   :  { %632 = vmatmul.mubr.msk.bf16.vlgmr.msra.gmra.mxu0 %vm293_vm1, %v679_v37  ;;  %p688_p0 = scmp.ne.s32.totalorder %s579_s1, %s687_s11  ;;  %p692_p1 = scmp.lt.s32.totalorder %s579_s1, %s579_s1 }
  0xaf   :  { %635 = vmatprep.mubr.msk.bf16.mxu0 %vm711_vm0, %v710_v8  ;;  %p693_p2 = scmp.lt.s32.totalorder %s691_s12, %s687_s11 }
  0xb0   :  { %v246_v1 = vpop.permute.xlu1 %245  ;;  %v241_v5 = vpop.permute.xlu0 %240 }
  0xb1   :  { %p694_p3 = por %p693_p2, %p692_p1 }
  0xb3   :  { %p695_p4 = pnand %p694_p3, %p688_p0 }
  0xb4   :  { %v236_v14 = vpop.permute.xlu1 %235  ;;  %v231_v17 = vpop.permute.xlu0 %230 }
  0xb6   :  { %636 = vmatmul.mubr.msk.bf16.gmra.mxu0 %vm293_vm1, %v680_v38 }
  0xb7   :  { %639 = vmatprep.mubr.msk.bf16.mxu0 %vm711_vm0, %v710_v8 }
  0xb8   :  { %v226_v23 = vpop.permute.xlu1 %225  ;;  %v221_v27 = vpop.permute.xlu0 %220 }
  0xbc   :  { %v410_v37 = vpop.permute.xlu0 %409  ;;  %v415_v38 = vpop.permute.xlu1 %414 }
  0xbe   :  { %640 = vmatmul.mubr.msk.bf16.gmra.mxu0 %vm293_vm1, %v681_v39 }
  0xbf   :  { %643 = vmatprep.mubr.msk.bf16.mxu0 %vm711_vm0, %v710_v8 }
  0xc0   :  { %v420_v39 = vpop.permute.xlu0 %419 }
  0xc6   :  { %644 = vmatmul.mubr.msk.bf16.gmra.mxu0 %vm293_vm1, %v682_v40 }
  0xc7   :  { %647 = vmatprep.mubr.msk.bf16.mxu0 %vm711_vm0, %v710_v8 }
  0xce   :  { %648 = vmatmul.mubr.msk.bf16.gmra.mxu0 %vm293_vm1, %v683_v41  ;;  %v425_v41 = vpop.permute.xlu1 %424 }
 0x16e   :  { %v343_v42 = vpop.f32.mrf.mxu0 }
 0x16f   :  { %v344_v28 = vadd.f32 %v343_v42, %v221_v27 }
 0x170   :  { %v633_v43 = vpop.f32.mrf.mxu0 }
 0x171   :  { %v382_v32 = vmax.f32 %v344_v28, 0.0  ;;  %v523_v43 = vpop.permute.xlu0 %522 }
 0x172   :  { %v346_v44 = vpop.f32.mrf.mxu0 }
 0x173   :  { %v347_v24 = vadd.f32 %v346_v44, %v226_v23 }
 0x174   :  { %v634_v45 = vpop.f32.mrf.mxu0 }
 0x175   :  { %v383_v30 = vmax.f32 %v347_v24, 0.0 }
 0x176   :  { %v351_v46 = vpop.f32.mrf.mxu0 }
 0x177   :  { %v352_v21 = vadd.f32 %v351_v46, %v231_v17  ;;  %v392_v33 = vpack.c.bf16 %v383_v30, %v382_v32 }
 0x178   :  { %v637_v47 = vpop.f32.mrf.mxu0 }
 0x179   :  { %v384_v29 = vmax.f32 %v352_v21, 0.0 }
 0x17a   :  { %v354_v48 = vpop.f32.mrf.mxu0 }
 0x17b   :  { %v355_v18 = vadd.f32 %v354_v48, %v236_v14  ;;  %v528_v48 = vpop.permute.xlu1 %527 }
 0x17c   :  { %v638_v49 = vpop.f32.mrf.mxu0 }
 0x17d   :  { %v385_v25 = vmax.f32 %v355_v18, 0.0 }
 0x17e   :  { %v359_v50 = vpop.f32.mrf.mxu0 }
 0x17f   :  { %v360_v15 = vadd.f32 %v359_v50, %v241_v5  ;;  %v393_v31 = vpack.c.bf16 %v385_v25, %v384_v29 }
 0x180   :  { %v641_v51 = vpop.f32.mrf.mxu0 }
 0x181   :  { %v386_v22 = vmax.f32 %v360_v15, 0.0  ;;  %v430_v51 = vpop.permute.xlu0 %429 }
 0x182   :  { %v362_v52 = vpop.f32.mrf.mxu0 }
 0x183   :  { %v363_v11 = vadd.f32 %v362_v52, %v246_v1 }
 0x184   :  { %v642_v53 = vpop.f32.mrf.mxu0 }
 0x185   :  { %v387_v19 = vmax.f32 %v363_v11, 0.0 }
 0x186   :  { %v367_v55 = vpop.f32.mrf.mxu0 }
 0x187   :  { %v368_v7 = vadd.f32 %v367_v55, %v251_v61  ;;  %v394_v26 = vpack.c.bf16 %v387_v19, %v386_v22 }
 0x188   :  { %v645_v57 = vpop.f32.mrf.mxu0 }
 0x189   :  { %v388_v16 = vmax.f32 %v368_v7, 0.0 }
 0x18a   :  { %v370_v58 = vpop.f32.mrf.mxu0 }
 0x18b   :  { %v371_v3 = vadd.f32 %v370_v58, %v256_v59  ;;  %v533_v58 = vpop.permute.xlu1 %532 }
 0x18c   :  { %v646_v60 = vpop.f32.mrf.mxu0 }
 0x18d   :  { %v389_v12 = vmax.f32 %v371_v3, 0.0 }
 0x18e   :  { %v375_v62 = vpop.f32.mrf.mxu0 }
 0x18f   :  { %v376_v0 = vadd.f32 %v375_v62, %v261_v56  ;;  %v395_v20 = vpack.c.bf16 %v389_v12, %v388_v16  ;;  %v543_v7 = vpop.permute.xlu1 %542 }
 0x190   :  { %v649_v63 = vpop.f32.mrf.mxu0 }
 0x191   :  { %v390_v9 = vmax.f32 %v376_v0, 0.0  ;;  %v538_v63 = vpop.permute.xlu0 %537 }
 0x192   :  { %v378_v2 = vpop.f32.mrf.mxu0 }
 0x193   :  { %v379_v4 = vadd.f32 %v378_v2, %v266_v54 }
 0x194   :  { %v650_v6 = vpop.f32.mrf.mxu0 }
 0x195   :  { %v391_v10 = vmax.f32 %v379_v4, 0.0  ;;  %v564_v21 = vpop.permute.xlu0 %563 }
 0x197   :  { %v396_v13 = vpack.c.bf16 %v391_v10, %v390_v9 }
 0x199   :  { %652 = vmatpush3.bf16.msra.mxu1 %v396_v13  ;;  %v566_v13 = vlaneseq }
 0x19a   :  { %653 = vmatprep.subr.bf16.mxu1 %v710_v8 }
 0x19b   :  { %v567_v16 = vshrl.u32 %v566_v13, 7 }
 0x19d   :  { %654 = vmatpush3.bf16.msra.mxu1 %v395_v20  ;;  %v568_v19 = vsub.s32 0, %v567_v16 }
 0x19e   :  { %655 = vmatprep.subr.bf16.mxu1 %v710_v8 }
 0x19f   :  { %v569_v23 = vrot.slane %v564_v21, %v568_v19 }
 0x1a1   :  { %656 = vmatpush3.bf16.msra.mxu1 %v394_v26 }
 0x1a2   :  { %657 = vmatprep.subr.bf16.mxu1 %v710_v8 }
 0x1a5   :  { %658 = vmatpush3.bf16.msra.mxu1 %v393_v31 }
 0x1a6   :  { %659 = vmatprep.subr.bf16.mxu1 %v710_v8 }
 0x1a9   :  { %660 = vmatpush3.bf16.msra.mxu1 %v392_v33 }
 0x1ac   :  { %662 = vmatmul.mubr.msk.bf16.vlgmr.msra.gmra.mxu1 %vm293_vm1, %v684_v34 }
 0x1ad   :  { %665 = vmatprep.mubr.msk.bf16.mxu1 %vm711_vm0, %v710_v8 }
 0x1b4   :  { %666 = vmatmul.mubr.msk.bf16.gmra.mxu1 %vm293_vm1, %v685_v35 }
 0x1b5   :  { %669 = vmatprep.mubr.msk.bf16.mxu1 %vm711_vm0, %v710_v8 }
 0x1bc   :  { %670 = vmatmul.mubr.msk.bf16.gmra.mxu1 %vm293_vm1, %v686_v36 }
 0x26c   :  { %v488_v40 = vpop.f32.mrf.mxu1 }
 0x26d   :  { %v489_v47 = vadd.f32 %v488_v40, %v410_v37 }
 0x26e   :  { %v663_v42 = vpop.f32.mrf.mxu1 }
 0x26f   :  { %v510_v53 = vmax.f32 %v489_v47, 0.0 }
 0x270   :  { %v491_v44 = vpop.f32.mrf.mxu1 }
 0x271   :  { %v492_v45 = vadd.f32 %v491_v44, %v415_v38  ;;  %v545_v60 = vmul.f32 %v523_v43, %v510_v53 }
 0x272   :  { %v664_v46 = vpop.f32.mrf.mxu1 }
 0x273   :  { %v511_v8 = vmax.f32 %v492_v45, 0.0 }
 0x274   :  { %v496_v49 = vpop.f32.mrf.mxu1 }
 0x275   :  { %v497_v50 = vadd.f32 %v496_v49, %v420_v39  ;;  %v546_v56 = vmul.f32 %v528_v48, %v511_v8 }
 0x276   :  { %v667_v52 = vpop.f32.mrf.mxu1 }
 0x277   :  { %v512_v54 = vmax.f32 %v497_v50, 0.0  ;;  %v550_v1 = vadd.f32 %v546_v56, %v545_v60 }
 0x278   :  { %v499_v55 = vpop.f32.mrf.mxu1 }
 0x279   :  { %v500_v57 = vadd.f32 %v499_v55, %v425_v41  ;;  %v547_v61 = vmul.f32 %v533_v58, %v512_v54 }
 0x27a   :  { %v668_v59 = vpop.f32.mrf.mxu1 }
 0x27b   :  { %v513_v62 = vmax.f32 %v500_v57, 0.0  ;;  %v551_v5 = vadd.f32 %v550_v1, %v547_v61 }
 0x27c   :  { %v504_v0 = vpop.f32.mrf.mxu1 }
 0x27d   :  { %v548_v2 = vmul.f32 %v538_v63, %v513_v62  ;;  %v505_v3 = vadd.f32 %v504_v0, %v430_v51 }
 0x27e   :  { %v671_v4 = vpop.f32.mrf.mxu1 }
 0x27f   :  { %v514_v6 = vmax.f32 %v505_v3, 0.0  ;;  %v552_v10 = vadd.f32 %v551_v5, %v548_v2 }
 0x280   :  { %v507_v9 = vpop.f32.mrf.mxu1 }
 0x281   :  { %v549_v11 = vmul.f32 %v543_v7, %v514_v6 }
 0x282   :  { %v672_v12 = vpop.f32.mrf.mxu1 }
 0x283   :  { %v553_v14 = vadd.f32 %v552_v10, %v549_v11 }
 0x285   :  { %v554_v15 = vrot.slane %v553_v14, 4 }
 0x287   :  { %v555_v17 = vadd.f32 %v554_v15, %v553_v14 }
 0x289   :  { %v556_v18 = vrot.slane %v555_v17, 2 }
 0x28b   :  { %v557_v20 = vadd.f32 %v556_v18, %v555_v17 }
 0x28d   :  { %v558_v22 = vrot.slane %v557_v20, 1 }
 0x28f   :  { %v559_v24 = vadd.f32 %v558_v22, %v557_v20 }
 0x291   :  { %v570_v25 = vadd.f32 %v569_v23, %v559_v24 }
 0x293   :  { %571 = vst [vmem:[#allocation3] sm:$0x1] %v570_v25 }
 0x294   :  { %698 = shalt.err (!%p695_p4)
}
 0x295   :  { %581 = dma.vmem_to_hbm [thread:$0]  %s579_s1, 16, %s959_s9, [#allocation4]  }
 0x296   :  { %707 = dma.done.wait [#allocation4], 16  }
 0x297   :  { %708 = vsyncadd [#allocation4], 4294967280 }
 0x298   :  { %585 = vsyncpa [#allocation4], 1 }

</bundles_post_ra>
